<compile_context>
chip_gen: v7x
topology: tpu7x:2x2x1
jax: 0.10.0
libtpu: 0.0.40
codegen_flags: <defaults>
</compile_context>

<pallas_src>
import functools

import jax
import jax.numpy as jnp
from jax.experimental import pallas as pl
from jax.experimental.pallas import tpu as pltpu


_LANE = 128            # lane width: H / T padded to a multiple of this
_SUBLANE = 8           # row-tile granularity
_TM_CAP = 512          # max rows per grid step (keeps tm x Hp f32 intermediate spill-free)
_VMEM_CAP = 48 << 20   # stay well under v7x's 64 MiB physical VMEM


def _round_up(v, m):
    return ((v + m - 1) // m) * m


def _mlp_kernel(x_ref, w1t_ref, b1_ref, w2t_ref, b2_ref, o_ref):
    # x_ref:   (tm, F)   input row tile           (compute dtype, e.g. bf16)
    # w1t_ref: (F, Hp)   fc_global.weight.T, zero-padded to Hp (compute dtype)
    # b1_ref:  (1, Hp)   fc_global.bias, zero-padded           (f32)
    # w2t_ref: (Hp, Tp)  out.weight.T, zero-padded             (compute dtype)
    # b2_ref:  (1, Tp)   out.bias, zero-padded                 (f32)
    # o_ref:   (tm, Tp)  lane-dense logits tile                (output dtype)
    h = jnp.dot(x_ref[...], w1t_ref[...], preferred_element_type=jnp.float32)
    h = jnp.maximum(h + b1_ref[...], 0.0)            # bias add + ReLU in f32
    h = h.astype(w2t_ref.dtype)                      # narrow operands for 2nd GEMM
    y = jnp.dot(h, w2t_ref[...], preferred_element_type=jnp.float32)
    o_ref[...] = (y + b2_ref[...]).astype(o_ref.dtype)


@functools.partial(jax.jit, static_argnames=("compute_dtype",))
def mlp_classifier_forward(x, w1, b1, w2, b2, *, compute_dtype=jnp.bfloat16):
    """x: [N, F]; w1: [H, F]; b1: [H]; w2: [T, H]; b2: [T] (PyTorch Linear layout)."""
    N, F = x.shape
    H = w1.shape[0]
    T = w2.shape[0]
    out_dtype = x.dtype

    Hp = _round_up(H, _LANE)
    Tp = _round_up(T, _LANE)

    # ---- plain-JAX glue: transpose + zero-pad to lane-dense shapes, cast MXU operands.
    w1t = jnp.zeros((F, Hp), compute_dtype).at[:, :H].set(w1.T.astype(compute_dtype))
    w2t = jnp.zeros((Hp, Tp), compute_dtype).at[:H, :T].set(w2.T.astype(compute_dtype))
    b1p = jnp.zeros((1, Hp), jnp.float32).at[:, :H].set(b1.astype(jnp.float32))
    b2p = jnp.zeros((1, Tp), jnp.float32).at[:, :T].set(b2.astype(jnp.float32))
    xc = x.astype(compute_dtype)

    # ---- row-tile selection: big tiles (per-step overhead ~0.35us), >=2 parallel
    # steps when N is large enough (feeds both v7x TensorCores), VMEM-budgeted.
    csz = jnp.dtype(compute_dtype).itemsize
    osz = jnp.dtype(out_dtype).itemsize
    if N > _TM_CAP:
        tm = _TM_CAP
    elif N > 2 * _LANE:
        tm = _round_up(pl.cdiv(N, 2), _SUBLANE)     # split rows across 2 grid steps
    else:
        tm = _round_up(N, _SUBLANE)

    def tile_bytes(t):
        return (2 * t * F * csz                      # x tiles (double-buffered)
                + 2 * F * Hp * csz                   # W1^T (resident)
                + 2 * Hp * Tp * csz                  # W2^T (resident)
                + 2 * (Hp + Tp) * 4                  # biases
                + 2 * t * Tp * osz                   # output tiles
                + t * Hp * (4 + csz))                # f32 h + its bf16 cast (working set)

    while tm > _SUBLANE and tile_bytes(tm) > _VMEM_CAP:
        tm = max(_SUBLANE, _round_up(tm // 2, _SUBLANE))

    grid = (pl.cdiv(N, tm),)
    vmem_limit = int(min(_VMEM_CAP, max(2 * tile_bytes(tm), 16 << 20)))

    cost = pl.CostEstimate(
        flops=2 * N * F * Hp + 2 * N * Hp * Tp,
        transcendentals=0,
        bytes_accessed=(N * F * csz + F * Hp * csz + Hp * Tp * csz
                        + (Hp + Tp) * 4 + N * Tp * osz),
    )

    out_padded = pl.pallas_call(
        _mlp_kernel,
        out_shape=jax.ShapeDtypeStruct((N, Tp), out_dtype),
        grid_spec=pltpu.PrefetchScalarGridSpec(
            num_scalar_prefetch=0,
            grid=grid,
            in_specs=[
                pl.BlockSpec((tm, F), lambda i: (i, 0)),    # x row tile
                pl.BlockSpec((F, Hp), lambda i: (0, 0)),    # W1^T (resident)
                pl.BlockSpec((1, Hp), lambda i: (0, 0)),    # b1
                pl.BlockSpec((Hp, Tp), lambda i: (0, 0)),   # W2^T (resident)
                pl.BlockSpec((1, Tp), lambda i: (0, 0)),    # b2
            ],
            out_specs=pl.BlockSpec((tm, Tp), lambda i: (i, 0)),
        ),
        compiler_params=pltpu.CompilerParams(
            dimension_semantics=("parallel",),
            vmem_limit_bytes=vmem_limit,
        ),
        cost_estimate=cost,
    )(xc, w1t, b1p, w2t, b2p)

    return out_padded[:, :T]   # drop lane padding to recover [N, dim_target]


if __name__ == "__main__":
    # Small shapes consistent with the module: N graphs, dim_features, hidden, target.
    N, dim_features, hidden_units, dim_target = 8, 16, 32, 4

    key = jax.random.PRNGKey(0)
    kx, kw1, kb1, kw2, kb2, kx2 = jax.random.split(key, 6)

    x = jax.random.normal(kx, (N, dim_features), dtype=jnp.float32)
    # `batch` exists in the PyTorch API but is unused by forward().
    batch = jnp.zeros((N,), dtype=jnp.int32)

    # Deterministic parameters (PyTorch Linear layout: [out, in]).
    w1 = jax.random.normal(kw1, (hidden_units, dim_features), jnp.float32) * 0.1
    b1 = jax.random.normal(kb1, (hidden_units,), jnp.float32) * 0.1
    w2 = jax.random.normal(kw2, (dim_target, hidden_units), jnp.float32) * 0.1
    b2 = jax.random.normal(kb2, (dim_target,), jnp.float32) * 0.1

    def ref(xv):
        return jnp.maximum(xv @ w1.T + b1, 0.0) @ w2.T + b2

    # Case 1: tiny batch.
    out = jax.block_until_ready(mlp_classifier_forward(x, w1, b1, w2, b2))
    assert out.shape == (N, dim_target)
    # bf16 MXU operands -> loosened tolerance vs. f32 reference.
    assert jnp.allclose(out, ref(x), atol=5e-2, rtol=5e-2)

    # Case 2: N not a multiple of the row tile, >=2 parallel grid steps.
    x2 = jax.random.normal(kx2, (300, dim_features), dtype=jnp.float32)
    out2 = jax.block_until_ready(mlp_classifier_forward(x2, w1, b1, w2, b2))
    assert out2.shape == (300, dim_target)
    assert jnp.allclose(out2, ref(x2), atol=5e-2, rtol=5e-2)

    print("KERNEL_OK")
</pallas_src>

<mosaic_0001>
module attributes {stable_mosaic.version = 11 : i64} {
  func.func @_mlp_kernel(%arg0: i32, %arg1: memref<8x16xbf16, #tpu.memory_space<vmem>>, %arg2: memref<16x128xbf16, #tpu.memory_space<vmem>>, %arg3: memref<1x128xf32, #tpu.memory_space<vmem>>, %arg4: memref<128x128xbf16, #tpu.memory_space<vmem>>, %arg5: memref<1x128xf32, #tpu.memory_space<vmem>>, %arg6: memref<8x128xf32, #tpu.memory_space<vmem>>) attributes {dimension_semantics = [#tpu.dimension_semantics<parallel>], iteration_bounds = array<i64: 1>, scalar_prefetch = 0 : i64, scratch_operands = 0 : i64, tpu.core_type = #tpu.core_type<tc>, window_params = [{transform_indices = @transform_0, window_bounds = array<i64: 8, 16>}, {pipeline_mode = #tpu.pipeline_mode<synchronous>, transform_indices = @transform_1, window_bounds = array<i64: 16, 128>}, {pipeline_mode = #tpu.pipeline_mode<synchronous>, transform_indices = @transform_2, window_bounds = array<i64: 1, 128>}, {pipeline_mode = #tpu.pipeline_mode<synchronous>, transform_indices = @transform_3, window_bounds = array<i64: 128, 128>}, {pipeline_mode = #tpu.pipeline_mode<synchronous>, transform_indices = @transform_4, window_bounds = array<i64: 1, 128>}, {transform_indices = @transform_5, window_bounds = array<i64: 8, 128>}]} {
    %c0 = arith.constant 0 : index
    %c0_0 = arith.constant 0 : index
    %0 = vector.load %arg1[%c0, %c0_0] : memref<8x16xbf16, #tpu.memory_space<vmem>>, vector<8x16xbf16>
    %c0_1 = arith.constant 0 : index
    %c0_2 = arith.constant 0 : index
    %1 = vector.load %arg2[%c0_1, %c0_2] : memref<16x128xbf16, #tpu.memory_space<vmem>>, vector<16x128xbf16>
    %cst = arith.constant dense<0.000000e+00> : vector<8x128xf32>
    %2 = tpu.matmul %0, %1, %cst {dimension_numbers = #tpu.dot_dimension_numbers<[1], [0], [0], [1], [0, 0, 1, 1], [], []>} : vector<8x16xbf16>, vector<16x128xbf16>, vector<8x128xf32> -> vector<8x128xf32>
    %c0_3 = arith.constant 0 : index
    %c0_4 = arith.constant 0 : index
    %3 = vector.load %arg3[%c0_3, %c0_4] : memref<1x128xf32, #tpu.memory_space<vmem>>, vector<1x128xf32>
    %4 = vector.broadcast %3 : vector<1x128xf32> to vector<8x128xf32>
    %5 = arith.addf %2, %4 : vector<8x128xf32>
    %cst_5 = arith.constant 0.000000e+00 : f32
    %6 = vector.broadcast %cst_5 : f32 to vector<8x128xf32>
    %7 = arith.maximumf %5, %6 : vector<8x128xf32>
    %8 = arith.truncf %7 : vector<8x128xf32> to vector<8x128xbf16>
    %c0_6 = arith.constant 0 : index
    %c0_7 = arith.constant 0 : index
    %9 = vector.load %arg4[%c0_6, %c0_7] : memref<128x128xbf16, #tpu.memory_space<vmem>>, vector<128x128xbf16>
    %cst_8 = arith.constant dense<0.000000e+00> : vector<8x128xf32>
    %10 = tpu.matmul %8, %9, %cst_8 {dimension_numbers = #tpu.dot_dimension_numbers<[1], [0], [0], [1], [0, 0, 1, 1], [], []>} : vector<8x128xbf16>, vector<128x128xbf16>, vector<8x128xf32> -> vector<8x128xf32>
    %c0_9 = arith.constant 0 : index
    %c0_10 = arith.constant 0 : index
    %11 = vector.load %arg5[%c0_9, %c0_10] : memref<1x128xf32, #tpu.memory_space<vmem>>, vector<1x128xf32>
    %12 = vector.broadcast %11 : vector<1x128xf32> to vector<8x128xf32>
    %13 = arith.addf %10, %12 : vector<8x128xf32>
    %c0_11 = arith.constant 0 : index
    %c0_12 = arith.constant 0 : index
    %14 = vector.load %arg6[%c0_11, %c0_12] : memref<8x128xf32, #tpu.memory_space<vmem>>, vector<8x128xf32>
    tpu.vector_store %arg6[%c0_11, %c0_12], %13 {strides = array<i32>} : memref<8x128xf32, #tpu.memory_space<vmem>>, vector<8x128xf32>,
    return
  }
  func.func @transform_0(%arg0: i32) -> (i32, i32) {
    %c0_i32 = arith.constant 0 : i32
    %c0_i32_0 = arith.constant 0 : i32
    return %arg0, %c0_i32 : i32, i32
  }
  func.func @transform_1(%arg0: i32) -> (i32, i32) {
    %c0_i32 = arith.constant 0 : i32
    %c0_i32_0 = arith.constant 0 : i32
    %c0_i32_1 = arith.constant 0 : i32
    return %c0_i32, %c0_i32_0 : i32, i32
  }
  func.func @transform_2(%arg0: i32) -> (i32, i32) {
    %c0_i32 = arith.constant 0 : i32
    %c0_i32_0 = arith.constant 0 : i32
    %c0_i32_1 = arith.constant 0 : i32
    return %c0_i32, %c0_i32_0 : i32, i32
  }
  func.func @transform_3(%arg0: i32) -> (i32, i32) {
    %c0_i32 = arith.constant 0 : i32
    %c0_i32_0 = arith.constant 0 : i32
    %c0_i32_1 = arith.constant 0 : i32
    return %c0_i32, %c0_i32_0 : i32, i32
  }
  func.func @transform_4(%arg0: i32) -> (i32, i32) {
    %c0_i32 = arith.constant 0 : i32
    %c0_i32_0 = arith.constant 0 : i32
    %c0_i32_1 = arith.constant 0 : i32
    return %c0_i32, %c0_i32_0 : i32, i32
  }
  func.func @transform_5(%arg0: i32) -> (i32, i32) {
    %c0_i32 = arith.constant 0 : i32
    %c0_i32_0 = arith.constant 0 : i32
    return %arg0, %c0_i32 : i32, i32
  }
}

</mosaic_0001>

<bundles_post_ra>
// kernel: mlp_classifier_forward.1
= control target key start
LH: loop header
LB: loop body
LE: loop exit
PB: predicated region body
PF: predicated region fallthrough
CT: control target
= control target key end

     0   :  { %v259_v0 = vmov 0.0   ;;  %vm260_vm0 = vmmov 0   ;;  %vm37_vm1 = vcmask 130048   ;;  %s330_s1 = inlined_call_operand.vmem [shape: bf16[16,128], index: 1, kind: input, shape index: {}]   ;;  %s331_s0 = inlined_call_operand.vmem [shape: bf16[8,16], index: 0, kind: input, shape index: {}]   ;;  %s332_s3 = inlined_call_operand.vmem [shape: bf16[128,128], index: 3, kind: input, shape index: {}]   ;;  %s333_s2 = inlined_call_operand.vmem [shape: f32[1,128], index: 2, kind: input, shape index: {}]   ;;  %s334_s4 = inlined_call_operand.vmem [shape: f32[1,128], index: 4, kind: input, shape index: {}]   ;;  %s335_s5 = inlined_call_operand.vmem [shape: f32[8,128], index: 5, kind: output, shape index: {}]  }
   0x1   :  { %222 = vmatprep.subr.bf16.mxu0 %v259_v0  ;;  %v250_v1 = vld [vmem:[%s330_s1] sm:$0xff]   ;;  %224 = vmatprep.mubr.msk.bf16.mxu0 %vm260_vm0, %v259_v0  ;;  %v252_v4 = vld [vmem:[%s332_s3 + $0x8] sm:$0xff]   ;;  %v253_v5 = vld [vmem:[%s332_s3 + $0x10] sm:$0xff]  }
   0x2   :  { %v21_v2 = vld [vmem:[%s331_s0] sm:$0xf]  ;;  %228 = vmatprep.subr.bf16.mxu1 %v259_v0  ;;  %244 = vmatprep.mubr.msk.bf16.mxu1 %vm260_vm0, %v259_v0  ;;  %v254_v6 = vld [vmem:[%s332_s3 + $0x18] sm:$0xff]   ;;  %v256_v8 = vld [vmem:[%s332_s3 + $0x28] sm:$0xff]  }
   0x3   :  { %223 = vmatpush3.bf16.msra.mxu0 %v250_v1  ;;  %v251_v3 = vld [vmem:[%s332_s3] sm:$0xff]   ;;  %v257_v9 = vld [vmem:[%s332_s3 + $0x30] sm:$0xff]   ;;  %v258_v10 = vld [vmem:[%s332_s3 + $0x38] sm:$0xff]  }
   0x4   :  { %229 = vmatpush3.bf16.msra.mxu1 %v251_v3  ;;  %v255_v7 = vld [vmem:[%s332_s3 + $0x20] sm:$0xff]  }
   0x5   :  { %230 = vmatprep.subr.bf16.mxu1 %v259_v0  ;;  %v199_v11 = vld [vmem:[%s333_s2] ss:$0 sm:$0xff] }
   0x6   :  { %225 = vmatmul.mubr.msk.bf16.vlgmr.msra.gmra.mrb[0].mxu0 %vm37_vm1, %v21_v2  ;;  %v202_v19 = vld [vmem:[%s334_s4] ss:$0 sm:$0xff] }
   0x8   :  { %231 = vmatpush3.bf16.msra.mxu1 %v252_v4 }
   0x9   :  { %232 = vmatprep.subr.bf16.mxu1 %v259_v0 }
   0xc   :  { %233 = vmatpush3.bf16.msra.mxu1 %v253_v5 }
   0xd   :  { %234 = vmatprep.subr.bf16.mxu1 %v259_v0 }
  0x10   :  { %235 = vmatpush3.bf16.msra.mxu1 %v254_v6 }
  0x11   :  { %236 = vmatprep.subr.bf16.mxu1 %v259_v0 }
  0x14   :  { %237 = vmatpush3.bf16.msra.mxu1 %v255_v7 }
  0x15   :  { %238 = vmatprep.subr.bf16.mxu1 %v259_v0 }
  0x18   :  { %239 = vmatpush3.bf16.msra.mxu1 %v256_v8 }
  0x19   :  { %240 = vmatprep.subr.bf16.mxu1 %v259_v0 }
  0x1c   :  { %241 = vmatpush3.bf16.msra.mxu1 %v257_v9 }
  0x1d   :  { %242 = vmatprep.subr.bf16.mxu1 %v259_v0 }
  0x20   :  { %243 = vmatpush3.bf16.msra.mxu1 %v258_v10 }
  0xd9   :  { %v75_v12 = vpop.f32.mrb[0].mxu0 }
  0xda   :  { %v76_v13 = vadd.f32 %v199_v11, %v75_v12  ;;  %v226_v14 = vpop.f32.mrb[1].mxu0 }
  0xdb   :  { %v78_v15 = vpop.f32.mrb[2].mxu0 }
  0xdc   :  { %v81_v16 = vmax.f32 %v76_v13, 0.0  ;;  %v227_v17 = vpop.f32.mrb[3].mxu0 }
  0xde   :  { %v82_v18 = vpack.c.bf16 %v81_v16, %v81_v16 }
  0xe0   :  { %245 = vmatmul.mubr.bf16.vlgmr.msra.gmra.mrb[0].mxu1 %v82_v18 }
 0x1b3   :  { %v188_v20 = vpop.f32.mrb[0].mxu1 }
 0x1b4   :  { %v189_v21 = vadd.f32 %v202_v19, %v188_v20  ;;  %v246_v22 = vpop.f32.mrb[1].mxu1 }
 0x1b5   :  { %v191_v23 = vpop.f32.mrb[2].mxu1 }
 0x1b6   :  { %194 = vst [vmem:[%s335_s5] sm:$0xff] %v189_v21  ;;  %v247_v24 = vpop.f32.mrb[3].mxu1 }

</bundles_post_ra>
